<compile_context>
chip_gen: v6e
topology: v6e:2x2x1
jax: 0.10.0
libtpu: 0.0.40
codegen_flags: <defaults>
</compile_context>

<pallas_src>
import numpy as np

import jax
import jax.numpy as jnp
from jax.experimental import pallas as pl
from jax.experimental.pallas import tpu as pltpu

_LN_EPS = 1e-5


def _rup8(x):
    return (x + 7) // 8 * 8


def _layernorm(x, gamma, beta):
    # One-pass form: the two reductions are independent (overlap on XLU).
    mu = jnp.mean(x, axis=-1, keepdims=True)
    msq = jnp.mean(x * x, axis=-1, keepdims=True)
    var = jnp.maximum(msq - mu * mu, 0.0)        # clamp cancellation noise
    return (x - mu) * jax.lax.rsqrt(var + _LN_EPS) * gamma + beta


# --------------------------------------------------------------------------
# Parameter slab layout / packing (host side)
# --------------------------------------------------------------------------
def _slab_layout(obs_dim, hidden, rec, act):
    """Row offsets for every parameter inside the packed (rows, sw) f32 slab."""
    sw = max(obs_dim, hidden, rec, act, 4 * rec, 128)    # lane width of the slab
    off = {}
    cursor = [0]

    def block(nrows):
        start = cursor[0]
        cursor[0] += _rup8(nrows)                # keep every block 8-row aligned
        return start

    b = block(2)                                 # feature_norm gamma/beta
    off["gfn"], off["bfn"] = b, b + 1
    off["w0"] = block(obs_dim)                   # (obs_dim, hidden)
    b = block(3)                                 # fc0 bias, ln0 gamma/beta
    off["b0"], off["g0"], off["be0"] = b, b + 1, b + 2
    off["wg"] = block(hidden + rec)              # fused GRU gate block (K=128, N=4*rec)
    b = block(3)                                 # fused gate bias row, GRU LN gamma/beta
    off["bg"], off["grg"], off["grb"] = b, b + 1, b + 2
    off["w1"] = block(rec)                       # (rec, act)
    b = block(5)                                 # fc1 bias, ln1 gamma/beta, wv row, bv
    off["b1"], off["g1"], off["be1"], off["wv"], off["bv"] = b, b + 1, b + 2, b + 3, b + 4
    return off, cursor[0], sw


def pack_params(p, obs_dim, hidden, rec, act):
    """Pack PyTorch-layout parameters into a single f32 slab (rows, sw)."""
    off, nrows, sw = _slab_layout(obs_dim, hidden, rec, act)
    slab = np.zeros((nrows, sw), np.float32)

    def put_row(name, vec, col=0):
        v = np.asarray(vec, np.float32).reshape(-1)
        slab[off[name], col: col + v.shape[0]] = v

    def put_mat(name, m, row0=0, col0=0):        # m is (in, out)
        m = np.asarray(m, np.float32)
        slab[off[name] + row0: off[name] + row0 + m.shape[0],
             col0: col0 + m.shape[1]] = m

    put_row("gfn", p["feature_norm.weight"])
    put_row("bfn", p["feature_norm.bias"])
    put_mat("w0", np.asarray(p["fc0.weight"], np.float32).T)     # torch (out,in) -> (in,out)
    put_row("b0", p["fc0.bias"])
    put_row("g0", p["ln0.weight"])
    put_row("be0", p["ln0.bias"])

    wih = np.asarray(p["gru.weight_ih_l0"], np.float32)          # (3*rec, hidden), gates r,z,n
    whh = np.asarray(p["gru.weight_hh_l0"], np.float32)          # (3*rec, rec)
    bih = np.asarray(p["gru.bias_ih_l0"], np.float32)
    bhh = np.asarray(p["gru.bias_hh_l0"], np.float32)
    # Fused gate block, rows = [x (hidden) ; h (rec)], cols:
    #   [0,rec)      = r gate (W_ir over W_hr)          -> gi_r + gh_r
    #   [rec,2rec)   = z gate (W_iz over W_hz)          -> gi_z + gh_z
    #   [2rec,3rec)  = W_in in x rows only              -> gi_n
    #   [3rec,4rec)  = W_hn in h rows only              -> gh_n
    put_mat("wg", wih[:rec].T,           row0=0,      col0=0)
    put_mat("wg", whh[:rec].T,           row0=hidden, col0=0)
    put_mat("wg", wih[rec:2 * rec].T,    row0=0,      col0=rec)
    put_mat("wg", whh[rec:2 * rec].T,    row0=hidden, col0=rec)
    put_mat("wg", wih[2 * rec:].T,       row0=0,      col0=2 * rec)
    put_mat("wg", whh[2 * rec:].T,       row0=hidden, col0=3 * rec)
    # Fused bias row at the SAME lane offsets as the gate columns.
    put_row("bg", bih[:rec] + bhh[:rec],                     col=0)
    put_row("bg", bih[rec:2 * rec] + bhh[rec:2 * rec],       col=rec)
    put_row("bg", bih[2 * rec:],                             col=2 * rec)
    put_row("bg", bhh[2 * rec:],                             col=3 * rec)
    put_row("grg", p["gru_norm.weight"])
    put_row("grb", p["gru_norm.bias"])

    put_mat("w1", np.asarray(p["fc1.weight"], np.float32).T)
    put_row("b1", p["fc1.bias"])
    put_row("g1", p["ln1.weight"])
    put_row("be1", p["ln1.bias"])
    put_row("wv", np.asarray(p["value_out.weight"], np.float32).reshape(-1))
    slab[off["bv"], 0] = float(np.asarray(p["value_out.bias"]).reshape(()))
    return jnp.asarray(slab), off, sw


# --------------------------------------------------------------------------
# Kernel
# --------------------------------------------------------------------------
def _make_kernel(obs_dim, hidden, rec, act, off):
    def kernel(obs_ref, h_ref, mask_ref, slab_ref, val_ref, hout_ref):
        f32 = jnp.float32

        def row(r0, width):                      # (1, width) parameter row view
            return slab_ref[r0:r0 + 1, 0:width]

        def mat(r0, nrows, width):               # (nrows, width) weight view
            return slab_ref[r0:r0 + nrows, 0:width]

        obs = obs_ref[...]
        h0 = h_ref[...] * mask_ref[...]          # mask resets the hidden state

        # --- MLPBase ----------------------------------------------------------
        x = _layernorm(obs, row(off["gfn"], obs_dim), row(off["bfn"], obs_dim))
        x = jnp.dot(x, mat(off["w0"], obs_dim, hidden), preferred_element_type=f32)
        x = jnp.maximum(x + row(off["b0"], hidden), 0.0)         # activation_id=1 -> ReLU
        x = _layernorm(x, row(off["g0"], hidden), row(off["be0"], hidden))

        # --- GRU (single step, single layer): ONE fused gate matmul ------------
        #   K = hidden+rec (full MXU height), N = 4*rec
        xh = jnp.concatenate([x, h0], axis=-1)                   # (B, hidden+rec)
        gates = jnp.dot(xh, mat(off["wg"], hidden + rec, 4 * rec),
                        preferred_element_type=f32) + row(off["bg"], 4 * rec)
        rz = jax.nn.sigmoid(gates[:, : 2 * rec])                 # r|z in one shot
        r = rz[:, :rec]
        z = rz[:, rec: 2 * rec]
        n = jnp.tanh(gates[:, 2 * rec: 3 * rec]                  # gi_n + b_in
                     + r * gates[:, 3 * rec: 4 * rec])           # r * (gh_n + b_hn)
        h_new = (1.0 - z) * n + z * h0
        hout_ref[...] = h_new

        y = _layernorm(h_new, row(off["grg"], rec), row(off["grb"], rec))

        # --- act MLP head -------------------------------------------------------
        y = jnp.dot(y, mat(off["w1"], rec, act), preferred_element_type=f32)
        y = jnp.maximum(y + row(off["b1"], act), 0.0)
        y = _layernorm(y, row(off["g1"], act), row(off["be1"], act))

        # --- value head: VPU lane-reduce instead of a 1-column MXU matmul -------
        wv = row(off["wv"], act)
        bv = slab_ref[off["bv"]:off["bv"] + 1, 0:1]
        val_ref[...] = jnp.sum(y * wv, axis=-1, keepdims=True) + bv

    return kernel


# --------------------------------------------------------------------------
# Wrapper
# --------------------------------------------------------------------------
def make_ppo_critic_forward(params, obs_dim, hidden, rec_hidden, act_hidden):
    slab, off, _ = pack_params(params, obs_dim, hidden, rec_hidden, act_hidden)
    n_rows, sw = slab.shape
    kernel = _make_kernel(obs_dim, hidden, rec_hidden, act_hidden, off)

    @jax.jit
    def _forward(obs, rnn_states, masks, slab_arg):
        B = obs.shape[0]
        h0 = rnn_states.reshape(B, rec_hidden)               # single recurrent layer

        # Tile choice: one tile up to 256 rows (latency optimal, B=1 grid step);
        # above that >=2 tiles (both v7x TensorCores) capped at 1024 rows/tile
        # (>=512-row tiles reach ~85% of HBM roofline; per-step overhead amortized).
        B_eff = _rup8(B)
        if B_eff <= 256:
            block_b = B_eff
        else:
            block_b = min(_rup8((B_eff + 1) // 2), 1024)
        n_b = -(-B_eff // block_b)
        B_pad = n_b * block_b
        if B_pad != B:
            pad = ((0, B_pad - B), (0, 0))
            obs_p = jnp.pad(obs, pad)
            h0_p = jnp.pad(h0, pad)
            m_p = jnp.pad(masks, pad)
        else:
            obs_p, h0_p, m_p = obs, h0, masks

        values, h_new = pl.pallas_call(
            kernel,
            grid=(n_b,),
            in_specs=[
                pl.BlockSpec((block_b, obs_dim), lambda i: (i, 0)),
                pl.BlockSpec((block_b, rec_hidden), lambda i: (i, 0)),
                pl.BlockSpec((block_b, 1), lambda i: (i, 0)),
                pl.BlockSpec((n_rows, sw), lambda i: (0, 0)),   # weight slab stays resident
            ],
            out_specs=(
                pl.BlockSpec((block_b, 1), lambda i: (i, 0)),
                pl.BlockSpec((block_b, rec_hidden), lambda i: (i, 0)),
            ),
            out_shape=(
                jax.ShapeDtypeStruct((B_pad, 1), jnp.float32),
                jax.ShapeDtypeStruct((B_pad, rec_hidden), jnp.float32),
            ),
            input_output_aliases={1: 1},                        # h0 buffer reused for h_new
            compiler_params=pltpu.CompilerParams(
                dimension_semantics=("parallel",),              # shard batch tiles across TCs
                vmem_limit_bytes=32 * 1024 * 1024,              # safe on v7x's 64 MiB VMEM
            ),
        )(obs_p, h0_p, m_p, slab_arg)

        return values[:B], h_new[:B].reshape(B, 1, rec_hidden)

    def forward(obs, rnn_states, masks):
        return _forward(obs, rnn_states, masks, slab)

    return forward


# --------------------------------------------------------------------------
# Deterministic synthetic parameters (PyTorch shapes) + pure-JAX reference
# --------------------------------------------------------------------------
def init_params(key, obs_dim, hidden, rec, act):
    ks = jax.random.split(key, 7)
    f32 = jnp.float32
    s = 0.1
    return {
        "feature_norm.weight": jnp.ones((obs_dim,), f32),
        "feature_norm.bias": jnp.zeros((obs_dim,), f32),
        "fc0.weight": s * jax.random.normal(ks[0], (hidden, obs_dim), f32),
        "fc0.bias": jnp.zeros((hidden,), f32),
        "ln0.weight": jnp.ones((hidden,), f32),
        "ln0.bias": jnp.zeros((hidden,), f32),
        "gru.weight_ih_l0": s * jax.random.normal(ks[1], (3 * rec, hidden), f32),
        "gru.weight_hh_l0": s * jax.random.normal(ks[2], (3 * rec, rec), f32),
        "gru.bias_ih_l0": s * jax.random.normal(ks[3], (3 * rec,), f32),
        "gru.bias_hh_l0": s * jax.random.normal(ks[4], (3 * rec,), f32),
        "gru_norm.weight": jnp.ones((rec,), f32),
        "gru_norm.bias": jnp.zeros((rec,), f32),
        "fc1.weight": s * jax.random.normal(ks[5], (act, rec), f32),
        "fc1.bias": jnp.zeros((act,), f32),
        "ln1.weight": jnp.ones((act,), f32),
        "ln1.bias": jnp.zeros((act,), f32),
        "value_out.weight": s * jax.random.normal(ks[6], (1, act), f32),
        "value_out.bias": jnp.zeros((1,), f32),
    }


def ppo_critic_reference(obs, rnn_states, masks, p, rec):
    def ln(x, g, b):
        mu = jnp.mean(x, -1, keepdims=True)
        var = jnp.mean((x - mu) ** 2, -1, keepdims=True)
        return (x - mu) * jax.lax.rsqrt(var + _LN_EPS) * g + b

    x = ln(obs, p["feature_norm.weight"], p["feature_norm.bias"])
    x = jnp.maximum(x @ p["fc0.weight"].T + p["fc0.bias"], 0.0)
    x = ln(x, p["ln0.weight"], p["ln0.bias"])
    B = obs.shape[0]
    h = rnn_states.reshape(B, rec) * masks
    gi = x @ p["gru.weight_ih_l0"].T + p["gru.bias_ih_l0"]
    gh = h @ p["gru.weight_hh_l0"].T + p["gru.bias_hh_l0"]
    r = jax.nn.sigmoid(gi[:, :rec] + gh[:, :rec])
    z = jax.nn.sigmoid(gi[:, rec:2 * rec] + gh[:, rec:2 * rec])
    n = jnp.tanh(gi[:, 2 * rec:] + r * gh[:, 2 * rec:])
    h_new = (1.0 - z) * n + z * h
    y = ln(h_new, p["gru_norm.weight"], p["gru_norm.bias"])
    y = jnp.maximum(y @ p["fc1.weight"].T + p["fc1.bias"], 0.0)
    y = ln(y, p["ln1.weight"], p["ln1.bias"])
    v = y @ p["value_out.weight"].T + p["value_out.bias"]
    return v, h_new.reshape(B, 1, rec)


if __name__ == "__main__":
    # Config consistent with the module: hidden_size=64, act_hidden_size=[32],
    # activation_id=1 (ReLU), use_feature_normalization=True,
    # use_recurrent_policy=True, recurrent_hidden_size=64,
    # recurrent_hidden_layers=1, obs_dim=32.
    B, OBS_DIM, HIDDEN, REC_HIDDEN, ACT_HIDDEN = 8, 32, 64, 64, 32

    key = jax.random.PRNGKey(0)
    k_obs, k_h, k_p = jax.random.split(key, 3)

    obs = jax.random.normal(k_obs, (B, OBS_DIM), jnp.float32)
    rnn_states = jax.random.normal(k_h, (B, 1, REC_HIDDEN), jnp.float32)
    masks = jnp.ones((B, 1), jnp.float32).at[0, 0].set(0.0)   # exercise the reset path

    params = init_params(k_p, OBS_DIM, HIDDEN, REC_HIDDEN, ACT_HIDDEN)
    critic_forward = make_ppo_critic_forward(params, OBS_DIM, HIDDEN, REC_HIDDEN, ACT_HIDDEN)

    values, new_rnn_states = critic_forward(obs, rnn_states, masks)
    jax.block_until_ready((values, new_rnn_states))

    assert values.shape == (B, 1)
    assert new_rnn_states.shape == (B, 1, REC_HIDDEN)

    # Correctness check against a pure-JAX reference of the same module.
    ref_v, ref_h = ppo_critic_reference(obs, rnn_states, masks, params, REC_HIDDEN)
    np.testing.assert_allclose(np.asarray(values), np.asarray(ref_v), rtol=2e-2, atol=2e-2)
    np.testing.assert_allclose(np.asarray(new_rnn_states), np.asarray(ref_h), rtol=2e-2, atol=2e-2)

    print("KERNEL_OK")
</pallas_src>

<mosaic_0001>
module attributes {stable_mosaic.version = 11 : i64} {
  func.func @kernel(%arg0: i32, %arg1: memref<8x32xf32, #tpu.memory_space<vmem>>, %arg2: memref<8x64xf32, #tpu.memory_space<vmem>>, %arg3: memref<8x1xf32, #tpu.memory_space<vmem>>, %arg4: memref<256x256xf32, #tpu.memory_space<vmem>>, %arg5: memref<8x1xf32, #tpu.memory_space<vmem>>, %arg6: memref<8x64xf32, #tpu.memory_space<vmem>>) attributes {dimension_semantics = [#tpu.dimension_semantics<parallel>], iteration_bounds = array<i64: 1>, scalar_prefetch = 0 : i64, scratch_operands = 0 : i64, tpu.core_type = #tpu.core_type<tc>, window_params = [{transform_indices = @transform_0, window_bounds = array<i64: 8, 32>}, {transform_indices = @transform_1, window_bounds = array<i64: 8, 64>}, {transform_indices = @transform_2, window_bounds = array<i64: 8, 1>}, {pipeline_mode = #tpu.pipeline_mode<synchronous>, transform_indices = @transform_3, window_bounds = array<i64: 256, 256>}, {transform_indices = @transform_4, window_bounds = array<i64: 8, 1>}, {transform_indices = @transform_5, window_bounds = array<i64: 8, 64>}]} {
    %c0 = arith.constant 0 : index
    %c0_0 = arith.constant 0 : index
    %0 = vector.load %arg1[%c0, %c0_0] : memref<8x32xf32, #tpu.memory_space<vmem>>, vector<8x32xf32>
    %c0_1 = arith.constant 0 : index
    %c0_2 = arith.constant 0 : index
    %1 = vector.load %arg2[%c0_1, %c0_2] : memref<8x64xf32, #tpu.memory_space<vmem>>, vector<8x64xf32>
    %c0_3 = arith.constant 0 : index
    %c0_4 = arith.constant 0 : index
    %2 = vector.load %arg3[%c0_3, %c0_4] : memref<8x1xf32, #tpu.memory_space<vmem>>, vector<8x1xf32>
    %3 = vector.broadcast %2 : vector<8x1xf32> to vector<8x64xf32>
    %4 = arith.mulf %1, %3 : vector<8x64xf32>
    %c0_5 = arith.constant 0 : index
    %c0_6 = arith.constant 0 : index
    %5 = vector.load %arg4[%c0_5, %c0_6] : memref<256x256xf32, #tpu.memory_space<vmem>>, vector<1x32xf32>
    %c1 = arith.constant 1 : index
    %c0_7 = arith.constant 0 : index
    %6 = vector.load %arg4[%c1, %c0_7] : memref<256x256xf32, #tpu.memory_space<vmem>>, vector<1x32xf32>
    %cst = arith.constant dense<0.000000e+00> : vector<8xf32>
    %7 = vector.multi_reduction <add>, %0, %cst [1] : vector<8x32xf32> to vector<8xf32>
    %8 = vector.shape_cast %7 : vector<8xf32> to vector<8x1xf32>
    %cst_8 = arith.constant 3.200000e+01 : f32
    %9 = vector.broadcast %cst_8 : f32 to vector<8x1xf32>
    %10 = arith.divf %8, %9 : vector<8x1xf32>
    %11 = arith.mulf %0, %0 : vector<8x32xf32>
    %cst_9 = arith.constant dense<0.000000e+00> : vector<8xf32>
    %12 = vector.multi_reduction <add>, %11, %cst_9 [1] : vector<8x32xf32> to vector<8xf32>
    %13 = vector.shape_cast %12 : vector<8xf32> to vector<8x1xf32>
    %cst_10 = arith.constant 3.200000e+01 : f32
    %14 = vector.broadcast %cst_10 : f32 to vector<8x1xf32>
    %15 = arith.divf %13, %14 : vector<8x1xf32>
    %16 = arith.mulf %10, %10 : vector<8x1xf32>
    %17 = arith.subf %15, %16 : vector<8x1xf32>
    %cst_11 = arith.constant 0.000000e+00 : f32
    %18 = vector.broadcast %cst_11 : f32 to vector<8x1xf32>
    %19 = arith.maximumf %17, %18 : vector<8x1xf32>
    %20 = vector.broadcast %10 : vector<8x1xf32> to vector<8x32xf32>
    %21 = arith.subf %0, %20 : vector<8x32xf32>
    %cst_12 = arith.constant 9.99999974E-6 : f32
    %22 = vector.broadcast %cst_12 : f32 to vector<8x1xf32>
    %23 = arith.addf %19, %22 : vector<8x1xf32>
    %24 = math.rsqrt %23 : vector<8x1xf32>
    %25 = vector.broadcast %24 : vector<8x1xf32> to vector<8x32xf32>
    %26 = arith.mulf %21, %25 : vector<8x32xf32>
    %27 = vector.broadcast %5 : vector<1x32xf32> to vector<8x32xf32>
    %28 = arith.mulf %26, %27 : vector<8x32xf32>
    %29 = vector.broadcast %6 : vector<1x32xf32> to vector<8x32xf32>
    %30 = arith.addf %28, %29 : vector<8x32xf32>
    %c8 = arith.constant 8 : index
    %c0_13 = arith.constant 0 : index
    %31 = vector.load %arg4[%c8, %c0_13] : memref<256x256xf32, #tpu.memory_space<vmem>>, vector<32x64xf32>
    %cst_14 = arith.constant dense<0.000000e+00> : vector<8x64xf32>
    %32 = tpu.matmul %30, %31, %cst_14 {dimension_numbers = #tpu.dot_dimension_numbers<[1], [0], [0], [1], [0, 0, 1, 1], [], []>} : vector<8x32xf32>, vector<32x64xf32>, vector<8x64xf32> -> vector<8x64xf32>
    %c40 = arith.constant 40 : index
    %c0_15 = arith.constant 0 : index
    %33 = vector.load %arg4[%c40, %c0_15] : memref<256x256xf32, #tpu.memory_space<vmem>>, vector<1x64xf32>
    %34 = vector.broadcast %33 : vector<1x64xf32> to vector<8x64xf32>
    %35 = arith.addf %32, %34 : vector<8x64xf32>
    %cst_16 = arith.constant 0.000000e+00 : f32
    %36 = vector.broadcast %cst_16 : f32 to vector<8x64xf32>
    %37 = arith.maximumf %35, %36 : vector<8x64xf32>
    %c41 = arith.constant 41 : index
    %c0_17 = arith.constant 0 : index
    %38 = vector.load %arg4[%c41, %c0_17] : memref<256x256xf32, #tpu.memory_space<vmem>>, vector<1x64xf32>
    %c42 = arith.constant 42 : index
    %c0_18 = arith.constant 0 : index
    %39 = vector.load %arg4[%c42, %c0_18] : memref<256x256xf32, #tpu.memory_space<vmem>>, vector<1x64xf32>
    %cst_19 = arith.constant dense<0.000000e+00> : vector<8xf32>
    %40 = vector.multi_reduction <add>, %37, %cst_19 [1] : vector<8x64xf32> to vector<8xf32>
    %41 = vector.shape_cast %40 : vector<8xf32> to vector<8x1xf32>
    %cst_20 = arith.constant 6.400000e+01 : f32
    %42 = vector.broadcast %cst_20 : f32 to vector<8x1xf32>
    %43 = arith.divf %41, %42 : vector<8x1xf32>
    %44 = arith.mulf %37, %37 : vector<8x64xf32>
    %cst_21 = arith.constant dense<0.000000e+00> : vector<8xf32>
    %45 = vector.multi_reduction <add>, %44, %cst_21 [1] : vector<8x64xf32> to vector<8xf32>
    %46 = vector.shape_cast %45 : vector<8xf32> to vector<8x1xf32>
    %cst_22 = arith.constant 6.400000e+01 : f32
    %47 = vector.broadcast %cst_22 : f32 to vector<8x1xf32>
    %48 = arith.divf %46, %47 : vector<8x1xf32>
    %49 = arith.mulf %43, %43 : vector<8x1xf32>
    %50 = arith.subf %48, %49 : vector<8x1xf32>
    %cst_23 = arith.constant 0.000000e+00 : f32
    %51 = vector.broadcast %cst_23 : f32 to vector<8x1xf32>
    %52 = arith.maximumf %50, %51 : vector<8x1xf32>
    %53 = vector.broadcast %43 : vector<8x1xf32> to vector<8x64xf32>
    %54 = arith.subf %37, %53 : vector<8x64xf32>
    %cst_24 = arith.constant 9.99999974E-6 : f32
    %55 = vector.broadcast %cst_24 : f32 to vector<8x1xf32>
    %56 = arith.addf %52, %55 : vector<8x1xf32>
    %57 = math.rsqrt %56 : vector<8x1xf32>
    %58 = vector.broadcast %57 : vector<8x1xf32> to vector<8x64xf32>
    %59 = arith.mulf %54, %58 : vector<8x64xf32>
    %60 = vector.broadcast %38 : vector<1x64xf32> to vector<8x64xf32>
    %61 = arith.mulf %59, %60 : vector<8x64xf32>
    %62 = vector.broadcast %39 : vector<1x64xf32> to vector<8x64xf32>
    %63 = arith.addf %61, %62 : vector<8x64xf32>
    %64 = tpu.concatenate %63, %4 in 1 : vector<8x64xf32>, vector<8x64xf32> -> vector<8x128xf32>
    %c48 = arith.constant 48 : index
    %c0_25 = arith.constant 0 : index
    %65 = vector.load %arg4[%c48, %c0_25] : memref<256x256xf32, #tpu.memory_space<vmem>>, vector<128x256xf32>
    %cst_26 = arith.constant dense<0.000000e+00> : vector<8x256xf32>
    %66 = tpu.matmul %64, %65, %cst_26 {dimension_numbers = #tpu.dot_dimension_numbers<[1], [0], [0], [1], [0, 0, 1, 1], [], []>} : vector<8x128xf32>, vector<128x256xf32>, vector<8x256xf32> -> vector<8x256xf32>
    %c176 = arith.constant 176 : index
    %c0_27 = arith.constant 0 : index
    %67 = vector.load %arg4[%c176, %c0_27] : memref<256x256xf32, #tpu.memory_space<vmem>>, vector<1x256xf32>
    %68 = vector.broadcast %67 : vector<1x256xf32> to vector<8x256xf32>
    %69 = arith.addf %66, %68 : vector<8x256xf32>
    %70 = vector.extract_strided_slice %69 {offsets = [0, 0], sizes = [8, 128], strides = [1, 1]} : vector<8x256xf32> to vector<8x128xf32>
    %71 = arith.negf %70 : vector<8x128xf32>
    %72 = math.exp %71 : vector<8x128xf32>
    %cst_28 = arith.constant 1.000000e+00 : f32
    %73 = vector.broadcast %cst_28 : f32 to vector<8x128xf32>
    %74 = arith.addf %73, %72 : vector<8x128xf32>
    %75 = arith.divf %73, %74 : vector<8x128xf32>
    %76 = vector.extract_strided_slice %75 {offsets = [0, 0], sizes = [8, 64], strides = [1, 1]} : vector<8x128xf32> to vector<8x64xf32>
    %77 = vector.extract_strided_slice %75 {offsets = [0, 64], sizes = [8, 64], strides = [1, 1]} : vector<8x128xf32> to vector<8x64xf32>
    %78 = vector.extract_strided_slice %69 {offsets = [0, 128], sizes = [8, 64], strides = [1, 1]} : vector<8x256xf32> to vector<8x64xf32>
    %79 = vector.extract_strided_slice %69 {offsets = [0, 192], sizes = [8, 64], strides = [1, 1]} : vector<8x256xf32> to vector<8x64xf32>
    %80 = arith.mulf %76, %79 : vector<8x64xf32>
    %81 = arith.addf %78, %80 : vector<8x64xf32>
    %82 = math.tanh %81 : vector<8x64xf32>
    %cst_29 = arith.constant 1.000000e+00 : f32
    %83 = vector.broadcast %cst_29 : f32 to vector<8x64xf32>
    %84 = arith.subf %83, %77 : vector<8x64xf32>
    %85 = arith.mulf %84, %82 : vector<8x64xf32>
    %86 = arith.mulf %77, %4 : vector<8x64xf32>
    %87 = arith.addf %85, %86 : vector<8x64xf32>
    %c0_30 = arith.constant 0 : index
    %c0_31 = arith.constant 0 : index
    %88 = vector.load %arg6[%c0_30, %c0_31] : memref<8x64xf32, #tpu.memory_space<vmem>>, vector<8x64xf32>
    tpu.vector_store %arg6[%c0_30, %c0_31], %87 {strides = array<i32>} : memref<8x64xf32, #tpu.memory_space<vmem>>, vector<8x64xf32>,
    %c177 = arith.constant 177 : index
    %c0_32 = arith.constant 0 : index
    %89 = vector.load %arg4[%c177, %c0_32] : memref<256x256xf32, #tpu.memory_space<vmem>>, vector<1x64xf32>
    %c178 = arith.constant 178 : index
    %c0_33 = arith.constant 0 : index
    %90 = vector.load %arg4[%c178, %c0_33] : memref<256x256xf32, #tpu.memory_space<vmem>>, vector<1x64xf32>
    %cst_34 = arith.constant dense<0.000000e+00> : vector<8xf32>
    %91 = vector.multi_reduction <add>, %87, %cst_34 [1] : vector<8x64xf32> to vector<8xf32>
    %92 = vector.shape_cast %91 : vector<8xf32> to vector<8x1xf32>
    %cst_35 = arith.constant 6.400000e+01 : f32
    %93 = vector.broadcast %cst_35 : f32 to vector<8x1xf32>
    %94 = arith.divf %92, %93 : vector<8x1xf32>
    %95 = arith.mulf %87, %87 : vector<8x64xf32>
    %cst_36 = arith.constant dense<0.000000e+00> : vector<8xf32>
    %96 = vector.multi_reduction <add>, %95, %cst_36 [1] : vector<8x64xf32> to vector<8xf32>
    %97 = vector.shape_cast %96 : vector<8xf32> to vector<8x1xf32>
    %cst_37 = arith.constant 6.400000e+01 : f32
    %98 = vector.broadcast %cst_37 : f32 to vector<8x1xf32>
    %99 = arith.divf %97, %98 : vector<8x1xf32>
    %100 = arith.mulf %94, %94 : vector<8x1xf32>
    %101 = arith.subf %99, %100 : vector<8x1xf32>
    %cst_38 = arith.constant 0.000000e+00 : f32
    %102 = vector.broadcast %cst_38 : f32 to vector<8x1xf32>
    %103 = arith.maximumf %101, %102 : vector<8x1xf32>
    %104 = vector.broadcast %94 : vector<8x1xf32> to vector<8x64xf32>
    %105 = arith.subf %87, %104 : vector<8x64xf32>
    %cst_39 = arith.constant 9.99999974E-6 : f32
    %106 = vector.broadcast %cst_39 : f32 to vector<8x1xf32>
    %107 = arith.addf %103, %106 : vector<8x1xf32>
    %108 = math.rsqrt %107 : vector<8x1xf32>
    %109 = vector.broadcast %108 : vector<8x1xf32> to vector<8x64xf32>
    %110 = arith.mulf %105, %109 : vector<8x64xf32>
    %111 = vector.broadcast %89 : vector<1x64xf32> to vector<8x64xf32>
    %112 = arith.mulf %110, %111 : vector<8x64xf32>
    %113 = vector.broadcast %90 : vector<1x64xf32> to vector<8x64xf32>
    %114 = arith.addf %112, %113 : vector<8x64xf32>
    %c184 = arith.constant 184 : index
    %c0_40 = arith.constant 0 : index
    %115 = vector.load %arg4[%c184, %c0_40] : memref<256x256xf32, #tpu.memory_space<vmem>>, vector<64x32xf32>
    %cst_41 = arith.constant dense<0.000000e+00> : vector<8x32xf32>
    %116 = tpu.matmul %114, %115, %cst_41 {dimension_numbers = #tpu.dot_dimension_numbers<[1], [0], [0], [1], [0, 0, 1, 1], [], []>} : vector<8x64xf32>, vector<64x32xf32>, vector<8x32xf32> -> vector<8x32xf32>
    %c248 = arith.constant 248 : index
    %c0_42 = arith.constant 0 : index
    %117 = vector.load %arg4[%c248, %c0_42] : memref<256x256xf32, #tpu.memory_space<vmem>>, vector<1x32xf32>
    %118 = vector.broadcast %117 : vector<1x32xf32> to vector<8x32xf32>
    %119 = arith.addf %116, %118 : vector<8x32xf32>
    %cst_43 = arith.constant 0.000000e+00 : f32
    %120 = vector.broadcast %cst_43 : f32 to vector<8x32xf32>
    %121 = arith.maximumf %119, %120 : vector<8x32xf32>
    %c249 = arith.constant 249 : index
    %c0_44 = arith.constant 0 : index
    %122 = vector.load %arg4[%c249, %c0_44] : memref<256x256xf32, #tpu.memory_space<vmem>>, vector<1x32xf32>
    %c250 = arith.constant 250 : index
    %c0_45 = arith.constant 0 : index
    %123 = vector.load %arg4[%c250, %c0_45] : memref<256x256xf32, #tpu.memory_space<vmem>>, vector<1x32xf32>
    %cst_46 = arith.constant dense<0.000000e+00> : vector<8xf32>
    %124 = vector.multi_reduction <add>, %121, %cst_46 [1] : vector<8x32xf32> to vector<8xf32>
    %125 = vector.shape_cast %124 : vector<8xf32> to vector<8x1xf32>
    %cst_47 = arith.constant 3.200000e+01 : f32
    %126 = vector.broadcast %cst_47 : f32 to vector<8x1xf32>
    %127 = arith.divf %125, %126 : vector<8x1xf32>
    %128 = arith.mulf %121, %121 : vector<8x32xf32>
    %cst_48 = arith.constant dense<0.000000e+00> : vector<8xf32>
    %129 = vector.multi_reduction <add>, %128, %cst_48 [1] : vector<8x32xf32> to vector<8xf32>
    %130 = vector.shape_cast %129 : vector<8xf32> to vector<8x1xf32>
    %cst_49 = arith.constant 3.200000e+01 : f32
    %131 = vector.broadcast %cst_49 : f32 to vector<8x1xf32>
    %132 = arith.divf %130, %131 : vector<8x1xf32>
    %133 = arith.mulf %127, %127 : vector<8x1xf32>
    %134 = arith.subf %132, %133 : vector<8x1xf32>
    %cst_50 = arith.constant 0.000000e+00 : f32
    %135 = vector.broadcast %cst_50 : f32 to vector<8x1xf32>
    %136 = arith.maximumf %134, %135 : vector<8x1xf32>
    %137 = vector.broadcast %127 : vector<8x1xf32> to vector<8x32xf32>
    %138 = arith.subf %121, %137 : vector<8x32xf32>
    %cst_51 = arith.constant 9.99999974E-6 : f32
    %139 = vector.broadcast %cst_51 : f32 to vector<8x1xf32>
    %140 = arith.addf %136, %139 : vector<8x1xf32>
    %141 = math.rsqrt %140 : vector<8x1xf32>
    %142 = vector.broadcast %141 : vector<8x1xf32> to vector<8x32xf32>
    %143 = arith.mulf %138, %142 : vector<8x32xf32>
    %144 = vector.broadcast %122 : vector<1x32xf32> to vector<8x32xf32>
    %145 = arith.mulf %143, %144 : vector<8x32xf32>
    %146 = vector.broadcast %123 : vector<1x32xf32> to vector<8x32xf32>
    %147 = arith.addf %145, %146 : vector<8x32xf32>
    %c251 = arith.constant 251 : index
    %c0_52 = arith.constant 0 : index
    %148 = vector.load %arg4[%c251, %c0_52] : memref<256x256xf32, #tpu.memory_space<vmem>>, vector<1x32xf32>
    %c252 = arith.constant 252 : index
    %c0_53 = arith.constant 0 : index
    %149 = vector.load %arg4[%c252, %c0_53] : memref<256x256xf32, #tpu.memory_space<vmem>>, vector<1x1xf32>
    %150 = vector.broadcast %148 : vector<1x32xf32> to vector<8x32xf32>
    %151 = arith.mulf %147, %150 : vector<8x32xf32>
    %cst_54 = arith.constant dense<0.000000e+00> : vector<8xf32>
    %152 = vector.multi_reduction <add>, %151, %cst_54 [1] : vector<8x32xf32> to vector<8xf32>
    %153 = vector.shape_cast %152 : vector<8xf32> to vector<8x1xf32>
    %154 = vector.broadcast %149 : vector<1x1xf32> to vector<8x1xf32>
    %155 = arith.addf %153, %154 : vector<8x1xf32>
    %c0_55 = arith.constant 0 : index
    %c0_56 = arith.constant 0 : index
    %156 = vector.load %arg5[%c0_55, %c0_56] : memref<8x1xf32, #tpu.memory_space<vmem>>, vector<8x1xf32>
    tpu.vector_store %arg5[%c0_55, %c0_56], %155 {strides = array<i32>} : memref<8x1xf32, #tpu.memory_space<vmem>>, vector<8x1xf32>,
    return
  }
  func.func @transform_0(%arg0: i32) -> (i32, i32) {
    %c0_i32 = arith.constant 0 : i32
    %c0_i32_0 = arith.constant 0 : i32
    return %arg0, %c0_i32 : i32, i32
  }
  func.func @transform_1(%arg0: i32) -> (i32, i32) {
    %c0_i32 = arith.constant 0 : i32
    %c0_i32_0 = arith.constant 0 : i32
    return %arg0, %c0_i32 : i32, i32
  }
  func.func @transform_2(%arg0: i32) -> (i32, i32) {
    %c0_i32 = arith.constant 0 : i32
    %c0_i32_0 = arith.constant 0 : i32
    return %arg0, %c0_i32 : i32, i32
  }
  func.func @transform_3(%arg0: i32) -> (i32, i32) {
    %c0_i32 = arith.constant 0 : i32
    %c0_i32_0 = arith.constant 0 : i32
    %c0_i32_1 = arith.constant 0 : i32
    return %c0_i32, %c0_i32_0 : i32, i32
  }
  func.func @transform_4(%arg0: i32) -> (i32, i32) {
    %c0_i32 = arith.constant 0 : i32
    %c0_i32_0 = arith.constant 0 : i32
    return %arg0, %c0_i32 : i32, i32
  }
  func.func @transform_5(%arg0: i32) -> (i32, i32) {
    %c0_i32 = arith.constant 0 : i32
    %c0_i32_0 = arith.constant 0 : i32
    return %arg0, %c0_i32 : i32, i32
  }
}

</mosaic_0001>

<bundles_post_ra>
// kernel: _forward.1
= control target key start
LH: loop header
LB: loop body
LE: loop exit
PB: predicated region body
PF: predicated region fallthrough
CT: control target
= control target key end

     0   :  { %11 = vsyncpa [#allocation3], 0  ;;  %s559_s18 = smov [#allocation2]   ;;  %s658_s0 = inlined_call_operand.vmem [shape: f32[8,32], index: 0, kind: input, shape index: {}]   ;;  %s659_s1 = inlined_call_operand.vmem [shape: f32[8,64], index: 1, kind: input, shape index: {}, may-alias: {1,5}]   ;;  %s660_s2 = inlined_call_operand.vmem [shape: f32[8,1], index: 2, kind: input, shape index: {}]   ;;  %s661_s3 = inlined_call_operand.hbm [shape: f32[256,256], index: 3, kind: input, shape index: {}]   ;;  %s662_s4 = inlined_call_operand.vmem [shape: f32[8,1], index: 4, kind: output, shape index: {0}]   ;;  %s663_s5 = inlined_call_operand.vmem [shape: f32[8,64], index: 5, kind: output, shape index: {1}, may-alias: {1,5}]  }
   0x1   :  { %s23_s19 = sshll.u32 %s559_s18, 4  ;;  %s24_s19 = int_to_ptr.vmem [resolvable:$true] %s23_s19 }
   0x2   :  { %s545_s20 = scalar_lea.vmem %s24_s19, 8192  ;;  %p550_p1 = scmp.lt.s32.totalorder %s24_s19, %s24_s19 }
   0x3   :  { %p546_p0 = scmp.ne.s32.totalorder %s24_s19, %s545_s20  ;;  %p551_p2 = scmp.lt.s32.totalorder %s545_s20, %s545_s20 }
   0x5   :  { %p552_p3 = por %p551_p2, %p550_p1 }
   0x7   :  { %p553_p4 = pnand %p552_p3, %p546_p0 }
   0x9   :  { %556 = shalt.err (!%p553_p4)
}
   0xa   :  { %s560_s21 = smov 256   ;;  %s561_s22 = smov 16  }
   0xb   :  { %29 = dma.hbm_to_vmem [thread:$0]  %s661_s3, 8192, %s24_s19, [#allocation3], %s560_s21, %s560_s21, %s561_s22  }
   0xc   :  { %557 = dma.done.wait [#allocation3], 8192  }
   0xd   :  { %558 = vsyncadd [#allocation3], 4294959104  ;;  %vm44_vm0 = vcmask 261120   ;;  %v33_v0 = vld [vmem:[%s658_s0] sm:$0xff]  ;;  %v562_v5 = vmov 0.0   ;;  %v66_v6 = vld [vmem:[#allocation2 + $0x30] sm:$0xff] }
   0xe   :  { %v45_v1 = vsel %vm44_vm0, %v33_v0, 0.0  ;;  %v50_v2 = vmul.f32 %v33_v0, %v33_v0  ;;  %v67_v4 = vld [vmem:[#allocation2 + $0x40] sm:$0xff]  ;;  %484 = vmatprep.subr.mxu0 %v562_v5  ;;  %vm563_vm1 = vmmov 0   ;;  %279 = vmatprep.mubr.f32.mxu1 %v562_v5  ;;  %v64_v8 = vld [vmem:[#allocation2 + $0x10] sm:$0xff]  ;;  %v564_v10 = vmov 0   ;;  %v201_v26 = vld [vmem:[#allocation2 + $0x158] sm:$0xff] }
   0xf   :  { %46 = vadd.xlane.f32.xlu0 %v45_v1  ;;  %492 = vmatprep.mubr.msk.f32.mxu0 %vm563_vm1, %v562_v5  ;;  %v65_v7 = vld [vmem:[#allocation2 + $0x20] sm:$0xff]  ;;  %v68_v27 = vld [vmem:[#allocation2 + $0x50] ss:$0 sm:$0xff]  ;;  %vm145_vm2 = vcmask 523264   ;;  %v199_v36 = vld [vmem:[#allocation2 + $0x148] sm:$0xff]  ;;  %s565_s28 = smov 64  }
  0x10   :  { %v51_v3 = vsel %vm44_vm0, %v50_v2, 0.0  ;;  %485 = vmatpush3.msra.mxu0 %v67_v4  ;;  %v35_v9 = vld [vmem:[%s660_s2] sm:$0xff]  ;;  %521 = vset.pattern.permute.xlu1 %v564_v10  ;;  %v200_v35 = vld [vmem:[#allocation2 + $0x150] sm:$0xff]  ;;  %v197_v38 = vld [vmem:[#allocation2 + $0x138] sm:$0xff]  ;;  %vm456_vm3 = vcmask 7168  }
  0x11   :  { %486 = vmatprep.subr.mxu0 %v562_v5  ;;  %522 = vset.pattern.permute.xlu0 %v564_v10  ;;  %v42_v21 = vld [vmem:[#allocation2] ss:$0 sm:$0xff]  ;;  %v43_v23 = vld [vmem:[#allocation2 + $0x1] ss:$0 sm:$0xff]  ;;  %v196_v39 = vld [vmem:[#allocation2 + $0x130] sm:$0xff] }
  0x12   :  { %487 = vmatpush3.msra.mxu0 %v66_v6  ;;  %38 = vperm.xlu1 %521, %v35_v9   ;;  %v198_v37 = vld [vmem:[#allocation2 + $0x140] sm:$0xff]  ;;  %v195_v40 = vld [vmem:[#allocation2 + $0x128] sm:$0xff]  ;;  %v193_v42 = vld [vmem:[#allocation2 + $0x118] sm:$0xff] }
  0x13   :  { %52 = vadd.xlane.f32.xlu0 %v51_v3  ;;  %488 = vmatprep.subr.mxu0 %v562_v5  ;;  %v194_v41 = vld [vmem:[#allocation2 + $0x120] sm:$0xff]  ;;  %v192_v45 = vld [vmem:[#allocation2 + $0x110] sm:$0xff]  ;;  %v191_v46 = vld [vmem:[#allocation2 + $0x108] sm:$0xff] }
  0x14   :  { %489 = vmatpush3.msra.mxu0 %v65_v7  ;;  %215 = vmatprep.subr.mxu1 %v201_v26  ;;  %v34_v44 = vld [vmem:[%s659_s1] sm:$0xff]  ;;  %v189_v49 = vld [vmem:[#allocation2 + $0xf8] sm:$0xff]  ;;  %v188_v50 = vld [vmem:[#allocation2 + $0xf0] sm:$0xff] }
  0x15   :  { %490 = vmatprep.subr.mxu0 %v562_v5  ;;  %216 = vmatpush1.msra.mxu1 %v200_v35  ;;  %v190_v47 = vld [vmem:[#allocation2 + $0x100] sm:$0xff]  ;;  %v187_v51 = vld [vmem:[#allocation2 + $0xe8] sm:$0xff]  ;;  %v185_v53 = vld [vmem:[#allocation2 + $0xd8] sm:$0xff] }
  0x16   :  { %491 = vmatpush3.msra.mxu0 %v64_v8  ;;  %217 = vmatprep.subr.mxu1 %v199_v36  ;;  %v186_v52 = vld [vmem:[#allocation2 + $0xe0] sm:$0xff]  ;;  %v184_v54 = vld [vmem:[#allocation2 + $0xd0] sm:$0xff]  ;;  %v183_v55 = vld [vmem:[#allocation2 + $0xc8] sm:$0xff] }
  0x17   :  { %495 = vmatprep.subr.mxu0 %v562_v5  ;;  %218 = vmatpush1.msra.mxu1 %v198_v37  ;;  %v182_v56 = vld [vmem:[#allocation2 + $0xc0] sm:$0xff]  ;;  %v181_v57 = vld [vmem:[#allocation2 + $0xb8] sm:$0xff]  ;;  %v180_v58 = vld [vmem:[#allocation2 + $0xb0] sm:$0xff] }
  0x18   :  { %219 = vmatprep.subr.mxu1 %v197_v38  ;;  %v179_v59 = vld [vmem:[#allocation2 + $0xa8] sm:$0xff]  ;;  %v178_v60 = vld [vmem:[#allocation2 + $0xa0] sm:$0xff]  ;;  %v177_v61 = vld [vmem:[#allocation2 + $0x98] sm:$0xff] }
  0x19   :  { %220 = vmatpush1.msra.mxu1 %v196_v39  ;;  %v176_v62 = vld [vmem:[#allocation2 + $0x90] sm:$0xff]  ;;  %v175_v63 = vld [vmem:[#allocation2 + $0x88] sm:$0xff]  ;;  %v173_v1 = vld [vmem:[#allocation2 + $0x78] sm:$0xff] }
  0x1a   :  { %221 = vmatprep.subr.mxu1 %v195_v40  ;;  %v172_v2 = vld [vmem:[#allocation2 + $0x70] sm:$0xff]  ;;  %v171_v3 = vld [vmem:[#allocation2 + $0x68] sm:$0xff]  ;;  %v170_v4 = vld [vmem:[#allocation2 + $0x60] sm:$0xff] }
  0x1b   :  { %222 = vmatpush1.msra.mxu1 %v194_v41  ;;  %v203_v26 = vld [vmem:[#allocation2 + $0x160] ss:$8 sm:$0x3] }
  0x1c   :  { %223 = vmatprep.subr.mxu1 %v193_v42 }
  0x1d   :  { %224 = vmatpush1.msra.mxu1 %v192_v45 }
  0x1e   :  { %225 = vmatprep.subr.mxu1 %v191_v46 }
  0x1f   :  { %226 = vmatpush1.msra.mxu1 %v190_v47 }
  0x20   :  { %227 = vmatprep.subr.mxu1 %v189_v49 }
  0x21   :  { %228 = vmatpush1.msra.mxu1 %v188_v50 }
  0x22   :  { %229 = vmatprep.subr.mxu1 %v187_v51 }
  0x23   :  { %230 = vmatpush1.msra.mxu1 %v186_v52  ;;  %v313_v52 = vld [vmem:[#allocation2 + $0x162] ss:$0 sm:$0xff] }
  0x24   :  { %231 = vmatprep.subr.mxu1 %v185_v53  ;;  %v312_v53 = vld [vmem:[#allocation2 + $0x161] ss:$0 sm:$0xff] }
  0x25   :  { %232 = vmatpush1.msra.mxu1 %v184_v54  ;;  %v351_v54 = vld [vmem:[#allocation2 + $0x1e0] sm:$0xff] }
  0x26   :  { %233 = vmatprep.subr.mxu1 %v183_v55  ;;  %v350_v55 = vld [vmem:[#allocation2 + $0x1d0] sm:$0xff] }
  0x27   :  { %234 = vmatpush1.msra.mxu1 %v182_v56  ;;  %v349_v56 = vld [vmem:[#allocation2 + $0x1c0] sm:$0xff] }
  0x28   :  { %235 = vmatprep.subr.mxu1 %v181_v57  ;;  %v348_v57 = vld [vmem:[#allocation2 + $0x1b0] sm:$0xff] }
  0x29   :  { %236 = vmatpush1.msra.mxu1 %v180_v58  ;;  %v347_v58 = vld [vmem:[#allocation2 + $0x1a0] sm:$0xff] }
  0x2a   :  { %237 = vmatprep.subr.mxu1 %v179_v59  ;;  %v346_v59 = vld [vmem:[#allocation2 + $0x190] sm:$0xff] }
  0x2b   :  { %238 = vmatpush1.msra.mxu1 %v178_v60  ;;  %v345_v60 = vld [vmem:[#allocation2 + $0x180] sm:$0xff] }
  0x2c   :  { %239 = vmatprep.subr.mxu1 %v177_v61  ;;  %v344_v61 = vld [vmem:[#allocation2 + $0x170] sm:$0xff] }
  0x2d   :  { %240 = vmatpush1.msra.mxu1 %v176_v62 }
  0x2e   :  { %241 = vmatprep.subr.mxu1 %v175_v63 }
  0x8d   :  { %v39_v43 = vpop.permute.xlu1 %38 }
  0x8e   :  { %v41_v48 = vmul.f32 %v39_v43, %v34_v44 }
  0x98   :  { %v47_v11 = vpop.xlane.xlu0 %46 }
  0x99   :  { %v49_v12 = vmul.f32 0.03125, %v47_v11 }
  0x9b   :  { %v55_v14 = vmul.f32 %v49_v12, %v49_v12  ;;  %v58_v19 = vsub.f32 %v33_v0, %v49_v12  ;;  %v174_v0 = vld [vmem:[#allocation2 + $0x80] sm:$0xff] }
  0x9c   :  { %v53_v13 = vpop.xlane.xlu0 %52  ;;  %242 = vmatpush1.msra.mxu1 %v174_v0 }
  0x9d   :  { %v54_v15 = vmul.f32 0.03125, %v53_v13  ;;  %243 = vmatprep.subr.mxu1 %v173_v1 }
  0x9e   :  { %244 = vmatpush1.msra.mxu1 %v172_v2 }
  0x9f   :  { %v56_v16 = vsub.f32 %v54_v15, %v55_v14  ;;  %245 = vmatprep.subr.mxu1 %v171_v3 }
  0xa0   :  { %246 = vmatpush1.msra.mxu1 %v170_v4 }
  0xa1   :  { %v57_v17 = vmax.f32 %v56_v16, 0.0  ;;  %v143_v16 = vld [vmem:[#allocation2 + $0x51] ss:$0 sm:$0xff] }
  0xa3   :  { %v59_v18 = vadd.f32 1e-05, %v57_v17 }
  0xa5   :  { %523 = vrsqrt.f32 %v59_v18  ;;  %v144_v18 = vld [vmem:[#allocation2 + $0x52] ss:$0 sm:$0xff] }
  0xb2   :  { %v524_v20 = vpop.eup %523 }
  0xb3   :  { %v61_v22 = vmul.f32 %v524_v20, %v58_v19 }
  0xb5   :  { %v62_v24 = vmul.f32 %v61_v22, %v42_v21 }
  0xb7   :  { %v63_v25 = vadd.f32 %v62_v24, %v43_v23  ;;  %v205_v23 = vlaneseq }
  0xb9   :  { %493 = vmatmul.mubr.msk.f32.vlgmr.msra.gmra.mxu0 %vm44_vm0, %v63_v25  ;;  %v206_v24 = vshrl.u32 %v205_v23, 7 }
  0xba   :  { %511 = vmatprep.mubr.msk.f32.mxu0 %vm563_vm1, %v562_v5  ;;  %496 = vmatpush3.msra.mxu0 %v351_v54 }
  0xbb   :  { %v211_v25 = vsub.s32 1, %v206_v24  ;;  %497 = vmatprep.subr.mxu0 %v562_v5 }
  0xbc   :  { %498 = vmatpush3.msra.mxu0 %v350_v55 }
  0xbd   :  { %499 = vmatprep.subr.mxu0 %v562_v5 }
  0xbe   :  { %500 = vmatpush3.msra.mxu0 %v349_v56 }
  0xbf   :  { %501 = vmatprep.subr.mxu0 %v562_v5 }
  0xc0   :  { %502 = vmatpush3.msra.mxu0 %v348_v57 }
  0xc1   :  { %503 = vmatprep.subr.mxu0 %v562_v5 }
  0xc2   :  { %504 = vmatpush3.msra.mxu0 %v347_v58 }
  0xc3   :  { %505 = vmatprep.subr.mxu0 %v562_v5 }
  0xc4   :  { %506 = vmatpush3.msra.mxu0 %v346_v59 }
  0xc5   :  { %507 = vmatprep.subr.mxu0 %v562_v5 }
  0xc6   :  { %508 = vmatpush3.msra.mxu0 %v345_v60 }
  0xc7   :  { %509 = vmatprep.subr.mxu0 %v562_v5 }
  0xc8   :  { %510 = vmatpush3.msra.mxu0 %v344_v61 }
 0x179   :  { %v138_v28 = vpop.f32.mrf.mxu0 }
 0x17a   :  { %v139_v29 = vadd.f32 %v138_v28, %v68_v27  ;;  %v212_v27 = vrot.slane %v203_v26, %v211_v25 }
 0x17b   :  { %v494_v30 = vpop.f32.mrf.mxu0 }
 0x17c   :  { %v618_v31 = vmax.f32 %v139_v29, 0.0 }
 0x17e   :  { %v146_v32 = vsel %vm145_vm2, %v618_v31, 0.0  ;;  %v151_v33 = vmul.f32 %v618_v31, %v618_v31 }
 0x17f   :  { %147 = vadd.xlane.f32.xlu1 %v146_v32 }
 0x180   :  { %v152_v34 = vsel %vm145_vm2, %v151_v33, 0.0 }
 0x181   :  { %153 = vadd.xlane.f32.xlu0 %v152_v34 }
 0x197   :  { %166 = vrot.lane.b32.xlu0 %v41_v48, %s565_s28 }
 0x208   :  { %v148_v6 = vpop.xlane.xlu1 %147 }
 0x209   :  { %v150_v7 = vmul.f32 0.015625, %v148_v6 }
 0x20a   :  { %v154_v8 = vpop.xlane.xlu0 %153 }
 0x20b   :  { %v156_v9 = vmul.f32 %v150_v7, %v150_v7  ;;  %v155_v10 = vmul.f32 0.015625, %v154_v8  ;;  %v159_v14 = vsub.f32 %v618_v31, %v150_v7  ;;  %v207_v31 = vsub.s32 0, %v206_v24 }
 0x20d   :  { %v157_v11 = vsub.f32 %v155_v10, %v156_v9  ;;  %v208_v32 = vrot.slane %v203_v26, %v207_v31 }
 0x20e   :  { %v167_v20 = vpop.permute.xlu0 %166 }
 0x20f   :  { %v158_v12 = vmax.f32 %v157_v11, 0.0 }
 0x211   :  { %v160_v13 = vadd.f32 1e-05, %v158_v12 }
 0x213   :  { %525 = vrsqrt.f32 %v160_v13 }
 0x220   :  { %v526_v15 = vpop.eup %525 }
 0x221   :  { %v162_v17 = vmul.f32 %v526_v15, %v159_v14  ;;  %v352_v14 = vld [vmem:[#allocation2 + $0x1f0] ss:$0 sm:$0xff] }
 0x223   :  { %v163_v19 = vmul.f32 %v162_v17, %v143_v16 }
 0x225   :  { %v164_v21 = vadd.f32 %v163_v19, %v144_v18 }
 0x227   :  { %v169_v22 = vsel %vm145_vm2, %v164_v21, %v167_v20 }
 0x228   :  { %280 = vmatmul.mubr.f32.vlgmr.msra.gmra.mxu1 %v169_v22 }
 0x2e8   :  { %v281_v28 = vpop.f32.mrf.mxu1 }
 0x2e9   :  { %v282_v33 = vadd.f32 %v281_v28, %v208_v32  ;;  %v429_v32 = vld [vmem:[#allocation2 + $0x1f1] ss:$0 sm:$0xff] }
 0x2ea   :  { %v283_v29 = vpop.f32.mrf.mxu1 }
 0x2eb   :  { %v284_v30 = vadd.f32 %v283_v29, %v212_v27  ;;  %v468_v34 = vmul.f32 -1.442695, %v282_v33 }
 0x2ed   :  { %293 = vrot.lane.b32.xlu0 %v284_v30, %s565_s28  ;;  %527 = vpow2.f32 %v468_v34  ;;  %v430_v34 = vld [vmem:[#allocation2 + $0x1f2] ss:$0 sm:$0xff] }
 0x2fa   :  { %v528_v35 = vpop.eup %527 }
 0x2fb   :  { %v289_v36 = vadd.f32 1.0, %v528_v35 }
 0x2fd   :  { %529 = vrcp.f32 %v289_v36  ;;  %v449_v36 = vld [vmem:[#allocation2 + $0x1f3] ss:$0 sm:$0xff] }
 0x30a   :  { %v530_v37 = vpop.eup %529 }
 0x30b   :  { %v299_v42 = vsub.f32 1.0, %v530_v37  ;;  %v305_v44 = vmul.f32 %v530_v37, %v167_v20 }
 0x35f   :  { %v294_v38 = vpop.permute.xlu0 %293 }
 0x360   :  { %v296_v39 = vmul.f32 %v530_v37, %v294_v38 }
 0x362   :  { %v297_v40 = vadd.f32 %v296_v39, %v284_v30 }
 0x364   :  { %531 = vtanh.f32 %v297_v40  ;;  %v450_v40 = vld [vmem:[#allocation2 + $0x1f4] ss:$0 sm:$0xff] }
 0x371   :  { %v532_v41 = vpop.eup %531 }
 0x372   :  { %301 = vrot.lane.b32.xlu0 %v532_v41, %s565_s28 }
 0x3e4   :  { %v302_v43 = vpop.permute.xlu0 %301 }
 0x3e5   :  { %v304_v45 = vmul.f32 %v302_v43, %v299_v42 }
 0x3e7   :  { %v306_v46 = vadd.f32 %v305_v44, %v304_v45 }
 0x3e9   :  { %308 = vrot.lane.b32.xlu1 %v306_v46, %s565_s28  ;;  %v318_v47 = vmul.f32 %v306_v46, %v306_v46 }
 0x3eb   :  { %320 = vrot.lane.b32.xlu0 %v318_v47, %s565_s28 }
 0x45b   :  { %v309_v48 = vpop.permute.xlu1 %308 }
 0x45c   :  { %311 = vst.msk [vmem:[%s663_s5] sm:$0xff] %vm145_vm2, %v309_v48  ;;  %v314_v49 = vsel %vm145_vm2, %v309_v48, 0.0 }
 0x45d   :  { %315 = vadd.xlane.f32.xlu0 %v314_v49  ;;  %v321_v50 = vpop.permute.xlu0 %320 }
 0x45e   :  { %v323_v51 = vsel %vm145_vm2, %v321_v50, 0.0 }
 0x45f   :  { %324 = vadd.xlane.f32.xlu1 %v323_v51 }
 0x470   :  { %340 = vrot.lane.b32.xlu1 %v313_v52, %s565_s28 }
 0x473   :  { %335 = vrot.lane.b32.xlu0 %v312_v53, %s565_s28 }
 0x4e6   :  { %v316_v62 = vpop.xlane.xlu0 %315 }
 0x4e7   :  { %v317_v63 = vmul.f32 0.015625, %v316_v62 }
 0x4e8   :  { %v325_v0 = vpop.xlane.xlu1 %324 }
 0x4e9   :  { %v327_v1 = vmul.f32 %v317_v63, %v317_v63  ;;  %v326_v2 = vmul.f32 0.015625, %v325_v0  ;;  %v330_v7 = vsub.f32 %v306_v46, %v317_v63 }
 0x4ea   :  { %v336_v9 = vpop.permute.xlu0 %335 }
 0x4eb   :  { %v328_v3 = vsub.f32 %v326_v2, %v327_v1 }
 0x4ec   :  { %v341_v11 = vpop.permute.xlu1 %340 }
 0x4ed   :  { %v329_v4 = vmax.f32 %v328_v3, 0.0 }
 0x4ef   :  { %v331_v6 = vadd.f32 1e-05, %v329_v4 }
 0x4f1   :  { %533 = vrsqrt.f32 %v331_v6 }
 0x4fe   :  { %v534_v8 = vpop.eup %533 }
 0x4ff   :  { %v333_v10 = vmul.f32 %v534_v8, %v330_v7 }
 0x501   :  { %v338_v12 = vmul.f32 %v336_v9, %v333_v10 }
 0x503   :  { %v343_v13 = vadd.f32 %v341_v11, %v338_v12 }
 0x505   :  { %354 = vrot.lane.b32.xlu0 %v343_v13, %s565_s28 }
 0x577   :  { %v355_v5 = vpop.permute.xlu0 %354 }
 0x578   :  { %512 = vmatmul.mubr.msk.f32.vlgmr.msra.gmra.mxu0 %vm145_vm2, %v355_v5 }
 0x638   :  { %v424_v15 = vpop.f32.mrf.mxu0 }
 0x639   :  { %v425_v16 = vadd.f32 %v424_v15, %v352_v14 }
 0x63a   :  { %v513_v17 = vpop.f32.mrf.mxu0 }
 0x63b   :  { %v428_v18 = vmax.f32 %v425_v16, 0.0 }
 0x63d   :  { %v431_v19 = vsel %vm44_vm0, %v428_v18, 0.0  ;;  %v435_v20 = vmul.f32 %v428_v18, %v428_v18 }
 0x63e   :  { %432 = vadd.xlane.f32.xlu0 %v431_v19 }
 0x63f   :  { %v436_v21 = vsel %vm44_vm0, %v435_v20, 0.0 }
 0x640   :  { %437 = vadd.xlane.f32.xlu1 %v436_v21 }
 0x6c7   :  { %v433_v22 = vpop.xlane.xlu0 %432 }
 0x6c8   :  { %v434_v23 = vmul.f32 0.03125, %v433_v22 }
 0x6c9   :  { %v438_v24 = vpop.xlane.xlu1 %437 }
 0x6ca   :  { %v440_v25 = vmul.f32 %v434_v23, %v434_v23  ;;  %v439_v26 = vmul.f32 0.03125, %v438_v24  ;;  %v443_v30 = vsub.f32 %v428_v18, %v434_v23 }
 0x6cc   :  { %v441_v27 = vsub.f32 %v439_v26, %v440_v25 }
 0x6ce   :  { %v442_v28 = vmax.f32 %v441_v27, 0.0 }
 0x6d0   :  { %v444_v29 = vadd.f32 1e-05, %v442_v28 }
 0x6d2   :  { %535 = vrsqrt.f32 %v444_v29 }
 0x6df   :  { %v536_v31 = vpop.eup %535 }
 0x6e0   :  { %v446_v33 = vmul.f32 %v536_v31, %v443_v30 }
 0x6e2   :  { %v447_v35 = vmul.f32 %v446_v33, %v429_v32 }
 0x6e4   :  { %v448_v37 = vadd.f32 %v447_v35, %v430_v34 }
 0x6e6   :  { %v451_v38 = vmul.f32 %v449_v36, %v448_v37 }
 0x6e8   :  { %v452_v39 = vsel %vm44_vm0, %v451_v38, 0.0 }
 0x6e9   :  { %453 = vadd.xlane.f32.xlu0 %v452_v39 }
 0x772   :  { %v454_v41 = vpop.xlane.xlu0 %453 }
 0x773   :  { %v455_v42 = vadd.f32 %v454_v41, %v450_v40 }
 0x775   :  { %457 = vst.msk [vmem:[%s662_s4] sm:$0xff] %vm456_vm3, %v455_v42 }
 0x776   :  { %466 = vsyncpa [#allocation3], 1 }

</bundles_post_ra>
